<compile_context>
chip_gen: v7x
topology: tpu7x:2x2x1
jax: 0.10.0
libtpu: 0.0.40
codegen_flags: <defaults>
</compile_context>

<pallas_src>
import jax
import jax.numpy as jnp
from jax.experimental import pallas as pl
from jax.experimental.pallas import tpu as pltpu

NEG_SLOPE = 0.2
LANE = 128


def _leaky_relu(y, slope):
    return jnp.where(y >= 0.0, y, slope * y)


def _linear_net_kernel(x_ref, w1_ref, b1_ref, w2_ref, b2_ref, w3_ref, b3_ref, o_ref):
    # Layer 1: [B, in] @ [in, 512] + b1 -> LeakyReLU(0.2)
    h = jnp.dot(x_ref[...].astype(jnp.bfloat16), w1_ref[...],
                preferred_element_type=jnp.float32)
    h = _leaky_relu(h + b1_ref[...], NEG_SLOPE)
    # Layer 2 (100 padded to 128 lanes): [B, 512] @ [512, 128] + b2 -> LeakyReLU(0.2)
    h = jnp.dot(h.astype(jnp.bfloat16), w2_ref[...],
                preferred_element_type=jnp.float32)
    h = _leaky_relu(h + b2_ref[...], NEG_SLOPE)
    # Layer 3 (out padded to 128 lanes): [B, 128] @ [128, 128] + b3
    y = jnp.dot(h.astype(jnp.bfloat16), w3_ref[...],
                preferred_element_type=jnp.float32)
    y = y + b3_ref[...]
    o_ref[...] = y.astype(o_ref.dtype)


def _ceil_to(n, m):
    return ((n + m - 1) // m) * m


def linear_net_forward(params, x):
    """Fused forward pass: Linear(in,512)+LReLU -> Linear(512,100)+LReLU -> Linear(100,out)."""
    (w1, b1), (w2, b2), (w3, b3) = params
    B, in_dim = x.shape
    hid1 = w1.shape[1]            # 512 (already lane-dense)
    hid2 = w2.shape[1]            # 100
    out_dim = w3.shape[1]         # e.g. 16
    hid2_p = _ceil_to(hid2, LANE)     # 128
    out_p = _ceil_to(out_dim, LANE)   # 128

    # Zero-pad the narrow dims to 128-lane multiples (exact: padded lanes stay 0).
    w2p = jnp.pad(w2, ((0, 0), (0, hid2_p - hid2)))
    b2p = jnp.pad(b2, (0, hid2_p - hid2))
    w3p = jnp.pad(w3, ((0, hid2_p - hid2), (0, out_p - out_dim)))
    b3p = jnp.pad(b3, (0, out_p - out_dim))

    # bf16 MXU operands (weights cast once, outside the kernel); biases stay f32.
    w1b = w1.astype(jnp.bfloat16)
    w2b = w2p.astype(jnp.bfloat16)
    w3b = w3p.astype(jnp.bfloat16)
    b1r = b1.reshape(1, hid1)
    b2r = b2p.reshape(1, hid2_p)
    b3r = b3p.reshape(1, out_p)

    flops = 2 * B * (in_dim * hid1 + hid1 * hid2_p + hid2_p * out_p)
    bytes_accessed = (x.size * 4
                      + (w1b.size + w2b.size + w3b.size) * 2
                      + (b1r.size + b2r.size + b3r.size) * 4
                      + B * out_p * 4)

    out_padded = pl.pallas_call(
        _linear_net_kernel,
        out_shape=jax.ShapeDtypeStruct((B, out_p), x.dtype),
        in_specs=[
            pl.BlockSpec((B, in_dim), lambda: (0, 0), memory_space=pltpu.VMEM),
            pl.BlockSpec(w1b.shape, lambda: (0, 0), memory_space=pltpu.VMEM),
            pl.BlockSpec(b1r.shape, lambda: (0, 0), memory_space=pltpu.VMEM),
            pl.BlockSpec(w2b.shape, lambda: (0, 0), memory_space=pltpu.VMEM),
            pl.BlockSpec(b2r.shape, lambda: (0, 0), memory_space=pltpu.VMEM),
            pl.BlockSpec(w3b.shape, lambda: (0, 0), memory_space=pltpu.VMEM),
            pl.BlockSpec(b3r.shape, lambda: (0, 0), memory_space=pltpu.VMEM),
        ],
        out_specs=pl.BlockSpec((B, out_p), lambda: (0, 0), memory_space=pltpu.VMEM),
        cost_estimate=pl.CostEstimate(
            flops=flops, transcendentals=0, bytes_accessed=bytes_accessed),
    )(x, w1b, b1r, w2b, b2r, w3b, b3r)

    return out_padded[:, :out_dim]


def init_params(key, in_dim, out_dim):
    """Deterministic init matching nn.Linear shapes (weights stored transposed: (in, out))."""
    dims = [(in_dim, 512), (512, 100), (100, out_dim)]
    params = []
    for d_in, d_out in dims:
        k_w, k_b, key = jax.random.split(key, 3)
        bound = 1.0 / (d_in ** 0.5)  # same scale as PyTorch's default init
        w = jax.random.uniform(k_w, (d_in, d_out), jnp.float32, -bound, bound)
        b = jax.random.uniform(k_b, (d_out,), jnp.float32, -bound, bound)
        params.append((w, b))
    return params


if __name__ == "__main__":
    in_dim, out_dim, batch = 32, 16, 8
    key = jax.random.PRNGKey(0)
    k_x, k_p = jax.random.split(key)
    x = jax.random.normal(k_x, (batch, in_dim), jnp.float32)
    params = init_params(k_p, in_dim, out_dim)

    out = jax.jit(linear_net_forward)(params, x)
    jax.block_until_ready(out)
    assert out.shape == (batch, out_dim)

    (w1, b1), (w2, b2), (w3, b3) = params

    # Reference matching the kernel's bf16-operand / f32-accumulate path.
    def ref_bf16(x):
        h = jnp.dot(x.astype(jnp.bfloat16), w1.astype(jnp.bfloat16),
                    preferred_element_type=jnp.float32) + b1
        h = jnp.where(h >= 0, h, 0.2 * h)
        h = jnp.dot(h.astype(jnp.bfloat16), w2.astype(jnp.bfloat16),
                    preferred_element_type=jnp.float32) + b2
        h = jnp.where(h >= 0, h, 0.2 * h)
        return jnp.dot(h.astype(jnp.bfloat16), w3.astype(jnp.bfloat16),
                       preferred_element_type=jnp.float32) + b3

    # Pure f32 reference (original module semantics).
    def ref_f32(x):
        h = x @ w1 + b1
        h = jnp.where(h >= 0, h, 0.2 * h)
        h = h @ w2 + b2
        h = jnp.where(h >= 0, h, 0.2 * h)
        return h @ w3 + b3

    assert jnp.allclose(out, ref_bf16(x), atol=2e-3, rtol=2e-3)
    assert jnp.allclose(out, ref_f32(x), atol=5e-2, rtol=5e-2)
    print("KERNEL_OK")
</pallas_src>

<mosaic_0001>
module attributes {stable_mosaic.version = 11 : i64} {
  func.func @_linear_net_kernel(%arg0: memref<8x32xf32, #tpu.memory_space<vmem>>, %arg1: memref<32x512xbf16, #tpu.memory_space<vmem>>, %arg2: memref<1x512xf32, #tpu.memory_space<vmem>>, %arg3: memref<512x128xbf16, #tpu.memory_space<vmem>>, %arg4: memref<1x128xf32, #tpu.memory_space<vmem>>, %arg5: memref<128x128xbf16, #tpu.memory_space<vmem>>, %arg6: memref<1x128xf32, #tpu.memory_space<vmem>>, %arg7: memref<8x128xf32, #tpu.memory_space<vmem>>) attributes {dimension_semantics = [], scalar_prefetch = 0 : i64, scratch_operands = 0 : i64, tpu.core_type = #tpu.core_type<tc>} {
    %c0 = arith.constant 0 : index
    %c0_0 = arith.constant 0 : index
    %0 = vector.load %arg0[%c0, %c0_0] : memref<8x32xf32, #tpu.memory_space<vmem>>, vector<8x32xf32>
    %1 = arith.truncf %0 : vector<8x32xf32> to vector<8x32xbf16>
    %c0_1 = arith.constant 0 : index
    %c0_2 = arith.constant 0 : index
    %2 = vector.load %arg1[%c0_1, %c0_2] : memref<32x512xbf16, #tpu.memory_space<vmem>>, vector<32x512xbf16>
    %cst = arith.constant dense<0.000000e+00> : vector<8x512xf32>
    %3 = tpu.matmul %1, %2, %cst {dimension_numbers = #tpu.dot_dimension_numbers<[1], [0], [0], [1], [0, 0, 1, 1], [], []>} : vector<8x32xbf16>, vector<32x512xbf16>, vector<8x512xf32> -> vector<8x512xf32>
    %c0_3 = arith.constant 0 : index
    %c0_4 = arith.constant 0 : index
    %4 = vector.load %arg2[%c0_3, %c0_4] : memref<1x512xf32, #tpu.memory_space<vmem>>, vector<1x512xf32>
    %5 = vector.broadcast %4 : vector<1x512xf32> to vector<8x512xf32>
    %6 = arith.addf %3, %5 : vector<8x512xf32>
    %cst_5 = arith.constant 0.000000e+00 : f32
    %7 = vector.broadcast %cst_5 : f32 to vector<8x512xf32>
    %8 = arith.cmpf oge, %6, %7 : vector<8x512xf32>
    %cst_6 = arith.constant 2.000000e-01 : f32
    %9 = vector.broadcast %cst_6 : f32 to vector<8x512xf32>
    %10 = arith.mulf %9, %6 : vector<8x512xf32>
    %11 = arith.select %8, %6, %10 : vector<8x512xi1>, vector<8x512xf32>
    %12 = arith.truncf %11 : vector<8x512xf32> to vector<8x512xbf16>
    %c0_7 = arith.constant 0 : index
    %c0_8 = arith.constant 0 : index
    %13 = vector.load %arg3[%c0_7, %c0_8] : memref<512x128xbf16, #tpu.memory_space<vmem>>, vector<512x128xbf16>
    %cst_9 = arith.constant dense<0.000000e+00> : vector<8x128xf32>
    %14 = tpu.matmul %12, %13, %cst_9 {dimension_numbers = #tpu.dot_dimension_numbers<[1], [0], [0], [1], [0, 0, 1, 1], [], []>} : vector<8x512xbf16>, vector<512x128xbf16>, vector<8x128xf32> -> vector<8x128xf32>
    %c0_10 = arith.constant 0 : index
    %c0_11 = arith.constant 0 : index
    %15 = vector.load %arg4[%c0_10, %c0_11] : memref<1x128xf32, #tpu.memory_space<vmem>>, vector<1x128xf32>
    %16 = vector.broadcast %15 : vector<1x128xf32> to vector<8x128xf32>
    %17 = arith.addf %14, %16 : vector<8x128xf32>
    %cst_12 = arith.constant 0.000000e+00 : f32
    %18 = vector.broadcast %cst_12 : f32 to vector<8x128xf32>
    %19 = arith.cmpf oge, %17, %18 : vector<8x128xf32>
    %cst_13 = arith.constant 2.000000e-01 : f32
    %20 = vector.broadcast %cst_13 : f32 to vector<8x128xf32>
    %21 = arith.mulf %20, %17 : vector<8x128xf32>
    %22 = arith.select %19, %17, %21 : vector<8x128xi1>, vector<8x128xf32>
    %23 = arith.truncf %22 : vector<8x128xf32> to vector<8x128xbf16>
    %c0_14 = arith.constant 0 : index
    %c0_15 = arith.constant 0 : index
    %24 = vector.load %arg5[%c0_14, %c0_15] : memref<128x128xbf16, #tpu.memory_space<vmem>>, vector<128x128xbf16>
    %cst_16 = arith.constant dense<0.000000e+00> : vector<8x128xf32>
    %25 = tpu.matmul %23, %24, %cst_16 {dimension_numbers = #tpu.dot_dimension_numbers<[1], [0], [0], [1], [0, 0, 1, 1], [], []>} : vector<8x128xbf16>, vector<128x128xbf16>, vector<8x128xf32> -> vector<8x128xf32>
    %c0_17 = arith.constant 0 : index
    %c0_18 = arith.constant 0 : index
    %26 = vector.load %arg6[%c0_17, %c0_18] : memref<1x128xf32, #tpu.memory_space<vmem>>, vector<1x128xf32>
    %27 = vector.broadcast %26 : vector<1x128xf32> to vector<8x128xf32>
    %28 = arith.addf %25, %27 : vector<8x128xf32>
    %c0_19 = arith.constant 0 : index
    %c0_20 = arith.constant 0 : index
    %29 = vector.load %arg7[%c0_19, %c0_20] : memref<8x128xf32, #tpu.memory_space<vmem>>, vector<8x128xf32>
    tpu.vector_store %arg7[%c0_19, %c0_20], %28 {strides = array<i32>} : memref<8x128xf32, #tpu.memory_space<vmem>>, vector<8x128xf32>,
    return
  }
}

</mosaic_0001>

<bundles_post_ra>
// kernel: linear_net_forward.1
= control target key start
LH: loop header
LB: loop body
LE: loop exit
PB: predicated region body
PF: predicated region fallthrough
CT: control target
= control target key end

     0   :  { %v880_v2 = vmov 0   ;;  %vm100_vm0 = vcmask 261120   ;;  %s1103_s0 = inlined_call_operand.vmem [shape: f32[8,32], index: 0, kind: input, shape index: {}]   ;;  %s1104_s1 = inlined_call_operand.vmem [shape: bf16[32,512], index: 1, kind: input, shape index: {}]   ;;  %s1105_s2 = inlined_call_operand.vmem [shape: f32[1,512], index: 2, kind: input, shape index: {}]   ;;  %s1106_s3 = inlined_call_operand.vmem [shape: bf16[512,128], index: 3, kind: input, shape index: {}]   ;;  %s1107_s4 = inlined_call_operand.vmem [shape: f32[1,128], index: 4, kind: input, shape index: {}]   ;;  %s1108_s5 = inlined_call_operand.vmem [shape: bf16[128,128], index: 5, kind: input, shape index: {}]   ;;  %s1109_s6 = inlined_call_operand.vmem [shape: f32[1,128], index: 6, kind: input, shape index: {}]   ;;  %s1110_s7 = inlined_call_operand.hbm [shape: f32[8,128], index: 7, kind: output, shape index: {}]  }
   0x1   :  { %v804_v0 = vld [vmem:[%s1104_s1 + $0x4] ss:$16 sps:$4 sm:$0xff]   ;;  %v806_v1 = vld [vmem:[%s1104_s1] ss:$16 sps:$4 sm:$0xff]   ;;  %136 = vmatprep.mubr.bf16.mxu1 %v880_v2  ;;  %v812_v6 = vld [vmem:[%s1104_s1 + $0xc] ss:$16 sps:$4 sm:$0xff]  }
   0x2   :  { %104 = vmatprep.subr.bf16.mxu1 %v804_v0  ;;  %v807_v3 = vld [vmem:[%s1104_s1 + $0x24] ss:$16 sps:$4 sm:$0xff]   ;;  %v809_v4 = vld [vmem:[%s1104_s1 + $0x20] ss:$16 sps:$4 sm:$0xff]   ;;  %v810_v7 = vld [vmem:[%s1104_s1 + $0x8] ss:$16 sps:$4 sm:$0xff]  }
   0x3   :  { %105 = vmatpush1.bf16.msra.mxu1 %v806_v1  ;;  %v28_v5 = vld [vmem:[%s1103_s0] sm:$0xff]  ;;  %v815_v9 = vld [vmem:[%s1104_s1 + $0x2c] ss:$16 sps:$4 sm:$0xff]   ;;  %v820_v14 = vld [vmem:[%s1106_s3 + $0x50] sm:$0xff]  }
   0x4   :  { %106 = vmatprep.subr.bf16.mxu1 %v807_v3  ;;  %v29_v8 = vpack.c.bf16 %v28_v5, %v28_v5  ;;  %v816_v10 = vld [vmem:[%s1106_s3 + $0x40] sm:$0xff]   ;;  %v818_v12 = vld [vmem:[%s1106_s3 + $0x48] sm:$0xff]   ;;  %v822_v17 = vld [vmem:[%s1106_s3 + $0x10] sm:$0xff]  }
   0x5   :  { %v817_v11 = vld [vmem:[%s1106_s3] sm:$0xff]   ;;  %727 = vmatprep.subr.bf16.mxu0 %v816_v10  ;;  %v819_v13 = vld [vmem:[%s1106_s3 + $0x8] sm:$0xff]   ;;  %v824_v18 = vld [vmem:[%s1106_s3 + $0x58] sm:$0xff]  }
   0x6   :  { %728 = vmatpush3.bf16.msra.mxu0 %v817_v11  ;;  %v813_v15 = vld [vmem:[%s1104_s1 + $0x28] ss:$16 sps:$4 sm:$0xff]   ;;  %v821_v16 = vld [vmem:[%s1106_s3 + $0xc0] sm:$0xff]   ;;  %v829_v24 = vld [vmem:[%s1106_s3 + $0xd0] sm:$0xff]  }
   0x7   :  { %107 = vmatpush1.bf16.msra.mxu1 %v809_v4  ;;  %729 = vmatprep.subr.bf16.mxu0 %v818_v12  ;;  %v823_v19 = vld [vmem:[%s1106_s3 + $0x80] sm:$0xff]   ;;  %v825_v20 = vld [vmem:[%s1106_s3 + $0xc8] sm:$0xff]   ;;  %v826_v21 = vld [vmem:[%s1106_s3 + $0x18] sm:$0xff]  }
   0x8   :  { %145 = vmatprep.subr.bf16.mxu1 %v812_v6  ;;  %v828_v22 = vld [vmem:[%s1106_s3 + $0x60] sm:$0xff]   ;;  %v827_v23 = vld [vmem:[%s1106_s3 + $0x88] sm:$0xff]   ;;  %v831_v27 = vld [vmem:[%s1106_s3 + $0x90] sm:$0xff]  }
   0x9   :  { %v830_v25 = vld [vmem:[%s1106_s3 + $0x20] sm:$0xff]   ;;  %v832_v26 = vld [vmem:[%s1106_s3 + $0x68] sm:$0xff]   ;;  %v833_v28 = vld [vmem:[%s1106_s3 + $0xd8] sm:$0xff]  }
   0xa   :  { %683 = vmatmul.mubr.msk.bf16.vlgmr.msra.gmra.mrb[0].mxu1 %vm100_vm0, %v29_v8  ;;  %730 = vmatpush3.bf16.msra.mxu0 %v819_v13  ;;  %v834_v29 = vld [vmem:[%s1106_s3 + $0x28] sm:$0xff]   ;;  %v835_v30 = vld [vmem:[%s1106_s3 + $0x98] sm:$0xff]  }
   0xb   :  { %146 = vmatpush1.bf16.msra.mxu1 %v810_v7  ;;  %177 = vmatprep.mubr.bf16.mxu1 %v880_v2 }
   0xc   :  { %147 = vmatprep.subr.bf16.mxu1 %v815_v9  ;;  %731 = vmatprep.subr.bf16.mxu0 %v820_v14 }
   0xe   :  { %732 = vmatpush3.bf16.msra.mxu0 %v822_v17 }
   0xf   :  { %148 = vmatpush1.bf16.msra.mxu1 %v813_v15  ;;  %733 = vmatprep.subr.bf16.mxu0 %v824_v18 }
  0x10   :  { %749 = vmatprep.subr.bf16.mxu1 %v821_v16 }
  0x12   :  { %684 = vmatmul.mubr.msk.bf16.vlgmr.msra.gmra.mrb[4].mxu1 %vm100_vm0, %v29_v8  ;;  %734 = vmatpush3.bf16.msra.mxu0 %v826_v21 }
  0x13   :  { %750 = vmatpush3.bf16.msra.mxu1 %v823_v19  ;;  %735 = vmatprep.subr.bf16.mxu0 %v828_v22 }
  0x14   :  { %751 = vmatprep.subr.bf16.mxu1 %v825_v20 }
  0x16   :  { %736 = vmatpush3.bf16.msra.mxu0 %v830_v25 }
  0x17   :  { %752 = vmatpush3.bf16.msra.mxu1 %v827_v23  ;;  %737 = vmatprep.subr.bf16.mxu0 %v832_v26 }
  0x18   :  { %753 = vmatprep.subr.bf16.mxu1 %v829_v24 }
  0x1a   :  { %738 = vmatpush3.bf16.msra.mxu0 %v834_v29 }
  0x1b   :  { %754 = vmatpush3.bf16.msra.mxu1 %v831_v27 }
  0x1c   :  { %755 = vmatprep.subr.bf16.mxu1 %v833_v28 }
  0x1f   :  { %756 = vmatpush3.bf16.msra.mxu1 %v835_v30 }
  0x20   :  { %12 = vsyncpa [#allocation3], 0  ;;  %v836_v31 = vld [vmem:[%s1106_s3 + $0x70] sm:$0xff]   ;;  %v837_v32 = vld [vmem:[%s1106_s3 + $0xe0] sm:$0xff]   ;;  %v881_v43 = vmov 0.0   ;;  %v40_v44 = vlaneseq  ;;  %vm882_vm5 = vmmov 0  }
  0x21   :  { %v838_v33 = vld [vmem:[%s1106_s3 + $0x30] sm:$0xff]   ;;  %v839_v34 = vld [vmem:[%s1106_s3 + $0xa0] sm:$0xff]   ;;  %739 = vmatprep.subr.bf16.mxu0 %v836_v31  ;;  %757 = vmatprep.subr.bf16.mxu1 %v837_v32  ;;  %v840_v35 = vld [vmem:[%s1106_s3 + $0x78] sm:$0xff]   ;;  %s883_s26 = smov [#allocation2]  }
  0x22   :  { %740 = vmatpush3.bf16.msra.mxu0 %v838_v33  ;;  %v841_v36 = vld [vmem:[%s1106_s3 + $0xe8] sm:$0xff]   ;;  %v842_v37 = vld [vmem:[%s1106_s3 + $0x38] sm:$0xff]   ;;  %v844_v39 = vld [vmem:[%s1106_s3 + $0xf0] sm:$0xff]   ;;  %v41_v45 = vshrl.u32 %v40_v44, 7  ;;  %s667_s27 = sshll.u32 %s883_s26, 4  ;;  %s668_s27 = int_to_ptr.vmem [resolvable:$true] %s667_s27 }
  0x23   :  { %758 = vmatpush3.bf16.msra.mxu1 %v839_v34  ;;  %v843_v38 = vld [vmem:[%s1106_s3 + $0xa8] sm:$0xff]   ;;  %741 = vmatprep.subr.bf16.mxu0 %v840_v35  ;;  %v845_v40 = vld [vmem:[%s1106_s3 + $0xb0] sm:$0xff]   ;;  %v846_v41 = vld [vmem:[%s1106_s3 + $0xf8] sm:$0xff]   ;;  %p861_p1 = scmp.lt.s32.totalorder %s668_s27, %s668_s27 }
  0x24   :  { %759 = vmatprep.subr.bf16.mxu1 %v841_v36  ;;  %v847_v42 = vld [vmem:[%s1106_s3 + $0xb8] sm:$0xff]   ;;  %v42_v46 = vsub.s32 0, %v41_v45  ;;  %v38_v47 = vld [vmem:[%s1105_s2] sm:$0xf]  ;;  %v46_v48 = vsub.s32 1, %v41_v45  ;;  %v50_v54 = vsub.s32 2, %v41_v45 }
  0x25   :  { %v54_v57 = vsub.s32 3, %v41_v45  ;;  %v848_v2 = vld [vmem:[%s1108_s5] sm:$0xff]   ;;  %v849_v11 = vld [vmem:[%s1108_s5 + $0x8] sm:$0xff]   ;;  %v850_v16 = vld [vmem:[%s1108_s5 + $0x10] sm:$0xff]  }
  0x26   :  { %742 = vmatpush3.bf16.msra.mxu0 %v842_v37  ;;  %v43_v49 = vrot.slane %v38_v47, %v42_v46  ;;  %v47_v50 = vrot.slane %v38_v47, %v46_v48  ;;  %v51_v61 = vrot.slane %v38_v47, %v50_v54  ;;  %v851_v18 = vld [vmem:[%s1108_s5 + $0x18] sm:$0xff]   ;;  %v852_v19 = vld [vmem:[%s1108_s5 + $0x20] sm:$0xff]   ;;  %v853_v20 = vld [vmem:[%s1108_s5 + $0x28] sm:$0xff]  }
  0x27   :  { %760 = vmatpush3.bf16.msra.mxu1 %v843_v38  ;;  %780 = vmatprep.subr.bf16.mxu0 %v881_v43  ;;  %v55_v63 = vrot.slane %v38_v47, %v54_v57  ;;  %v854_v21 = vld [vmem:[%s1108_s5 + $0x30] sm:$0xff]   ;;  %v855_v22 = vld [vmem:[%s1108_s5 + $0x38] sm:$0xff]   ;;  %v685_v28 = vld [vmem:[%s1107_s4] ss:$0 sm:$0xff]  ;;  %s856_s4 = scalar_lea.vmem %s668_s27, 128 }
  0x28   :  { %761 = vmatprep.subr.bf16.mxu1 %v844_v39  ;;  %v718_v39 = vld [vmem:[%s1109_s6] ss:$0 sm:$0xff]  ;;  %p857_p0 = scmp.ne.s32.totalorder %s668_s27, %s856_s4  ;;  %p862_p2 = scmp.lt.s32.totalorder %s856_s4, %s856_s4 }
  0x2a   :  { %p863_p3 = por %p862_p2, %p861_p1 }
  0x2b   :  { %762 = vmatpush3.bf16.msra.mxu1 %v845_v40 }
  0x2c   :  { %763 = vmatprep.subr.bf16.mxu1 %v846_v41  ;;  %p864_p4 = pnand %p863_p3, %p857_p0 }
  0x2f   :  { %764 = vmatpush3.bf16.msra.mxu1 %v847_v42 }
  0xdd   :  { %v138_v51 = vpop.f32.mrb[0].mxu1 }
  0xde   :  { %v139_v52 = vadd.f32 %v138_v51, %v43_v49  ;;  %v140_v53 = vpop.f32.mrb[1].mxu1 }
  0xdf   :  { %v141_v55 = vadd.f32 %v140_v53, %v47_v50  ;;  %v142_v56 = vpop.f32.mrb[2].mxu1 }
  0xe0   :  { %vm186_vm1 = vcmp.ge.f32.partialorder %v139_v52, 0.0  ;;  %v190_v58 = vmul.f32 0.2, %v139_v52  ;;  %v143_v59 = vpop.f32.mrb[3].mxu1 }
  0xe1   :  { %vm187_vm2 = vcmp.ge.f32.partialorder %v141_v55, 0.0  ;;  %v191_v60 = vmul.f32 0.2, %v141_v55 }
  0xe2   :  { %v194_v62 = vsel %vm186_vm1, %v139_v52, %v190_v58 }
  0xe3   :  { %v195_v0 = vsel %vm187_vm2, %v141_v55, %v191_v60  ;;  %v198_v4 = vpack.c.bf16 %v194_v62, %v194_v62 }
  0xe4   :  { %v199_v1 = vpack.c.bf16 %v195_v0, %v195_v0 }
  0xe5   :  { %v179_v3 = vpop.f32.mrb[4].mxu1 }
  0xe6   :  { %v180_v5 = vadd.f32 %v179_v3, %v51_v61  ;;  %v181_v6 = vpop.f32.mrb[5].mxu1  ;;  %497 = vmatprep.mubr.bf16.mxu0 %v199_v1 }
  0xe7   :  { %v182_v7 = vadd.f32 %v181_v6, %v55_v63  ;;  %v183_v8 = vpop.f32.mrb[6].mxu1  ;;  %498 = vmatmul.mubr.bf16.vlgmr.msra.gmra.mrb[0].mxu0 %v198_v4 }
  0xe8   :  { %vm188_vm3 = vcmp.ge.f32.partialorder %v180_v5, 0.0  ;;  %v192_v9 = vmul.f32 0.2, %v180_v5  ;;  %v184_v10 = vpop.f32.mrb[7].mxu1  ;;  %781 = vmatpush3.bf16.msra.mxu0 %v848_v2  ;;  %796 = vmatprep.mubr.msk.bf16.mxu0 %vm882_vm5, %v881_v43 }
  0xe9   :  { %vm189_vm4 = vcmp.ge.f32.partialorder %v182_v7, 0.0  ;;  %v193_v12 = vmul.f32 0.2, %v182_v7  ;;  %782 = vmatprep.subr.bf16.mxu0 %v881_v43 }
  0xea   :  { %v196_v13 = vsel %vm188_vm3, %v180_v5, %v192_v9 }
  0xeb   :  { %v197_v14 = vsel %vm189_vm4, %v182_v7, %v193_v12  ;;  %v200_v17 = vpack.c.bf16 %v196_v13, %v196_v13 }
  0xec   :  { %v201_v15 = vpack.c.bf16 %v197_v14, %v197_v14  ;;  %783 = vmatpush3.bf16.msra.mxu0 %v849_v11 }
  0xed   :  { %784 = vmatprep.subr.bf16.mxu0 %v881_v43 }
  0xee   :  { %537 = vmatprep.mubr.bf16.mxu1 %v201_v15 }
  0xef   :  { %538 = vmatmul.mubr.bf16.vlgmr.msra.gmra.mrb[8].mxu1 %v200_v17 }
  0xf0   :  { %785 = vmatpush3.bf16.msra.mxu0 %v850_v16 }
  0xf1   :  { %786 = vmatprep.subr.bf16.mxu0 %v881_v43 }
  0xf4   :  { %787 = vmatpush3.bf16.msra.mxu0 %v851_v18 }
  0xf5   :  { %788 = vmatprep.subr.bf16.mxu0 %v881_v43 }
  0xf8   :  { %789 = vmatpush3.bf16.msra.mxu0 %v852_v19 }
  0xf9   :  { %790 = vmatprep.subr.bf16.mxu0 %v881_v43 }
  0xfc   :  { %791 = vmatpush3.bf16.msra.mxu0 %v853_v20 }
  0xfd   :  { %792 = vmatprep.subr.bf16.mxu0 %v881_v43 }
 0x100   :  { %793 = vmatpush3.bf16.msra.mxu0 %v854_v21 }
 0x101   :  { %794 = vmatprep.subr.bf16.mxu0 %v881_v43 }
 0x104   :  { %795 = vmatpush3.bf16.msra.mxu0 %v855_v22 }
 0x1ba   :  { %v743_v23 = vpop.f32.mrb[0].mxu0 }
 0x1bb   :  { %v744_v24 = vpop.f32.mrb[1].mxu0 }
 0x1bc   :  { %v745_v25 = vadd.f32 %v744_v24, %v743_v23  ;;  %v746_v26 = vpop.f32.mrb[2].mxu0 }
 0x1bd   :  { %v747_v27 = vpop.f32.mrb[3].mxu0 }
 0x1be   :  { %v500_v31 = vadd.f32 %v745_v25, %v685_v28 }
 0x1c2   :  { %v765_v29 = vpop.f32.mrb[8].mxu1 }
 0x1c3   :  { %v766_v30 = vpop.f32.mrb[9].mxu1 }
 0x1c4   :  { %v767_v32 = vadd.f32 %v766_v30, %v765_v29  ;;  %v768_v33 = vpop.f32.mrb[10].mxu1 }
 0x1c5   :  { %v769_v34 = vpop.f32.mrb[11].mxu1 }
 0x1c6   :  { %v540_v35 = vadd.f32 %v767_v32, %v500_v31 }
 0x1c8   :  { %vm545_vm6 = vcmp.ge.f32.partialorder %v540_v35, 0.0  ;;  %v546_v36 = vmul.f32 0.2, %v540_v35 }
 0x1ca   :  { %v547_v37 = vsel %vm545_vm6, %v540_v35, %v546_v36 }
 0x1cb   :  { %v548_v38 = vpack.c.bf16 %v547_v37, %v547_v37 }
 0x1cd   :  { %797 = vmatmul.mubr.bf16.vlgmr.msra.gmra.mrb[4].mxu0 %v548_v38 }
 0x2a0   :  { %v654_v40 = vpop.f32.mrb[4].mxu0 }
 0x2a1   :  { %v655_v41 = vadd.f32 %v718_v39, %v654_v40  ;;  %v798_v42 = vpop.f32.mrb[5].mxu0 }
 0x2a2   :  { %v657_v43 = vpop.f32.mrb[6].mxu0 }
 0x2a3   :  { %660 = vst [vmem:[#allocation2] sm:$0xff] %v655_v41  ;;  %v799_v44 = vpop.f32.mrb[7].mxu0 }
 0x2a4   :  { %867 = shalt.err (!%p864_p4)
}
 0x2a5   :  { %s868_s6 = scalar_lea.hbm %s1110_s7, 128 }
 0x2a6   :  { %p869_p5 = scmp.ne.s32.totalorder %s1110_s7, %s868_s6  ;;  %p872_p6 = scmp.lt.u32.totalorder %s868_s6, %s1110_s7 }
 0x2a8   :  { %p874_p7 = pnand %p872_p6, %p869_p5 }
 0x2aa   :  { %877 = shalt.err (!%p874_p7)
}
 0x2ab   :  { %670 = dma.vmem_to_hbm [thread:$0]  %s668_s27, 128, %s1110_s7, [#allocation3]  }
 0x2ac   :  { %878 = dma.done.wait [#allocation3], 128  }
 0x2ad   :  { %879 = vsyncadd [#allocation3], 4294967168 }
 0x2ae   :  { %674 = vsyncpa [#allocation3], 1 }

</bundles_post_ra>
